<compile_context>
chip_gen: v6e
topology: v6e:2x2x1
jax: 0.10.0
libtpu: 0.0.40
codegen_flags: <defaults>
</compile_context>

<pallas_src>
import functools

import jax
import jax.numpy as jnp
from jax import lax
from jax.experimental import pallas as pl

K = 9       # conv1 kernel size (NewConvNN: kernel_size=9, padding=0, stride=1)
COUT = 2    # conv1 out_channels


def _fused_forward_kernel(p_ref, wc_ref, bc_ref, wfct_ref, bfc_ref, o_ref, *,
                          n_batch, s_pool):
    # p_ref:    (F, 4*N*S)   im2col patches, lane index = j*(N*S) + n*S + s
    #                        (j = 2x2 pool-window position, s = ph*PW + pw)
    # wc_ref:   (COUT, F)    conv1 weight, im2col layout (c, kh, kw)
    # bc_ref:   (COUT, 1)    conv1 bias
    # wfct_ref: (COUT*S, OUT) fc1 weight, pre-transposed
    # bfc_ref:  (1, OUT)     fc1 bias
    # o_ref:    (N, OUT)
    ns = n_batch * s_pool

    # conv1 as one lane-dense MXU matmul over all batch / pool positions.
    acc = jnp.dot(wc_ref[...], p_ref[...], preferred_element_type=jnp.float32)

    # 2x2 maxpool: max over the 4 pool-window positions (contiguous 32-lane
    # slices).  Bias-after-max and ReLU-after-pool are exact (bias constant
    # over the window, ReLU monotone).
    pooled = acc[:, 0:ns]
    for j in range(1, 4):
        pooled = jnp.maximum(pooled, acc[:, j * ns:(j + 1) * ns])
    pooled = jnp.maximum(pooled + bc_ref[...], 0.0)            # (COUT, N*S)

    # Flatten in PyTorch .view(-1, COUT*S) order: flat[n, c*S+s] = pooled[c, n*S+s].
    flat = jnp.concatenate(
        [jnp.concatenate(
            [pooled[c:c + 1, n * s_pool:(n + 1) * s_pool] for c in range(COUT)],
            axis=1)
         for n in range(n_batch)],
        axis=0)                                                # (N, COUT*S)

    # fc1 + ReLU.
    y = jnp.dot(flat, wfct_ref[...], preferred_element_type=jnp.float32) + bfc_ref[...]
    o_ref[...] = jnp.maximum(y, 0.0)


def pack_params(wconv, bconv, wfc, bfc):
    """Pre-pack PyTorch-layout parameters once, outside the jitted hot path."""
    c_in = wconv.shape[1]
    f = c_in * K * K
    return (wconv.reshape(COUT, f),      # (COUT, F)
            bconv.reshape(COUT, 1),      # (COUT, 1)
            wfc.T,                       # (adapter_dim, OUT)
            bfc.reshape(1, -1))          # (1, OUT)


def new_conv_nn_forward(x, wconv_mat, bconv_col, wfc_t, bfc_row):
    N, C, H, W = x.shape
    OH, OW = H - K + 1, W - K + 1
    PH, PW = OH // 2, OW // 2
    S = PH * PW
    F = C * K * K
    out_dim = wfc_t.shape[1]

    # im2col in one fused XLA op:
    #   patches[n, c*K*K + kh*K + kw, oh, ow] = x[n, c, oh+kh, ow+kw]
    patches = lax.conv_general_dilated_patches(
        x, filter_shape=(K, K), window_strides=(1, 1), padding="VALID")
    # Repack so the lane (last) dim is 4*N*S (=128 for the demo shapes),
    # ordered pool-window-position-major, then batch, then pooled spatial s.
    p = patches.reshape(N, F, PH, 2, PW, 2)      # oh = 2*ph+dh, ow = 2*pw+dw
    p = p.transpose(1, 3, 5, 0, 2, 4)            # (F, dh, dw, N, PH, PW)
    p = p.reshape(F, 4 * N * S)                  # lane = (dh*2+dw)*N*S + n*S + s

    kernel = functools.partial(_fused_forward_kernel, n_batch=N, s_pool=S)
    out = pl.pallas_call(
        kernel,
        out_shape=jax.ShapeDtypeStruct((N, out_dim), jnp.float32),
    )(p, wconv_mat, bconv_col, wfc_t, bfc_row)

    # TODO(synk): NewConvNN.forward also calls self.fc2/fc3/fc4, but those
    # layers are never defined in NewConvNN.__init__ (AttributeError in
    # PyTorch); omitted.
    return out


if __name__ == "__main__":
    key = jax.random.PRNGKey(0)
    kx, kw1, kb1, kw2, kb2 = jax.random.split(key, 5)

    # img_dim = (4, 16, 16), output_dim = 10 (fc1_dim/fc2_dim/fc3_dim unused)
    N, C, H, W = 2, 4, 16, 16
    OUT_DIM = 10
    adapter_dim = COUT * ((H - K + 1) // 2) * ((W - K + 1) // 2)   # 2*4*4 = 32

    x = jax.random.normal(kx, (N, C, H, W), jnp.float32)
    wconv = jax.random.normal(kw1, (COUT, C, K, K), jnp.float32) * 0.05
    bconv = jax.random.normal(kb1, (COUT,), jnp.float32) * 0.05
    wfc = jax.random.normal(kw2, (OUT_DIM, adapter_dim), jnp.float32) * 0.1
    bfc = jax.random.normal(kb2, (OUT_DIM,), jnp.float32) * 0.1

    params = pack_params(wconv, bconv, wfc, bfc)   # one-time pre-pack
    fwd = jax.jit(new_conv_nn_forward)
    out = jax.block_until_ready(fwd(x, *params))

    # Plain-JAX reference for a correctness check.
    conv = lax.conv_general_dilated(
        x, wconv, window_strides=(1, 1), padding="VALID",
        dimension_numbers=("NCHW", "OIHW", "NCHW"))
    conv = jnp.maximum(conv + bconv[None, :, None, None], 0.0)
    pooled_ref = lax.reduce_window(
        conv, -jnp.inf, lax.max, (1, 1, 2, 2), (1, 1, 2, 2), "VALID")
    flat_ref = pooled_ref.reshape(N, -1)
    ref = jnp.maximum(flat_ref @ wfc.T + bfc, 0.0)

    assert out.shape == (N, OUT_DIM)
    assert jnp.allclose(out, ref, atol=1e-4, rtol=1e-4)
    print("KERNEL_OK")
</pallas_src>

<mosaic_0001>
module attributes {stable_mosaic.version = 11 : i64} {
  func.func @_fused_forward_kernel(%arg0: memref<324x128xf32, #tpu.memory_space<vmem>>, %arg1: memref<2x324xf32, #tpu.memory_space<vmem>>, %arg2: memref<2x1xf32, #tpu.memory_space<vmem>>, %arg3: memref<32x10xf32, #tpu.memory_space<vmem>>, %arg4: memref<1x10xf32, #tpu.memory_space<vmem>>, %arg5: memref<2x10xf32, #tpu.memory_space<vmem>>) attributes {dimension_semantics = [], scalar_prefetch = 0 : i64, scratch_operands = 0 : i64, tpu.core_type = #tpu.core_type<tc>} {
    %c0 = arith.constant 0 : index
    %c0_0 = arith.constant 0 : index
    %0 = vector.load %arg1[%c0, %c0_0] : memref<2x324xf32, #tpu.memory_space<vmem>>, vector<2x324xf32>
    %c0_1 = arith.constant 0 : index
    %c0_2 = arith.constant 0 : index
    %1 = vector.load %arg0[%c0_1, %c0_2] : memref<324x128xf32, #tpu.memory_space<vmem>>, vector<324x128xf32>
    %cst = arith.constant dense<0.000000e+00> : vector<2x128xf32>
    %2 = tpu.matmul %0, %1, %cst {dimension_numbers = #tpu.dot_dimension_numbers<[1], [0], [0], [1], [0, 0, 1, 1], [], []>} : vector<2x324xf32>, vector<324x128xf32>, vector<2x128xf32> -> vector<2x128xf32>
    %3 = vector.extract_strided_slice %2 {offsets = [0, 0], sizes = [2, 32], strides = [1, 1]} : vector<2x128xf32> to vector<2x32xf32>
    %4 = vector.extract_strided_slice %2 {offsets = [0, 32], sizes = [2, 32], strides = [1, 1]} : vector<2x128xf32> to vector<2x32xf32>
    %5 = arith.maximumf %3, %4 : vector<2x32xf32>
    %6 = vector.extract_strided_slice %2 {offsets = [0, 64], sizes = [2, 32], strides = [1, 1]} : vector<2x128xf32> to vector<2x32xf32>
    %7 = arith.maximumf %5, %6 : vector<2x32xf32>
    %8 = vector.extract_strided_slice %2 {offsets = [0, 96], sizes = [2, 32], strides = [1, 1]} : vector<2x128xf32> to vector<2x32xf32>
    %9 = arith.maximumf %7, %8 : vector<2x32xf32>
    %c0_3 = arith.constant 0 : index
    %c0_4 = arith.constant 0 : index
    %10 = vector.load %arg2[%c0_3, %c0_4] : memref<2x1xf32, #tpu.memory_space<vmem>>, vector<2x1xf32>
    %11 = vector.broadcast %10 : vector<2x1xf32> to vector<2x32xf32>
    %12 = arith.addf %9, %11 : vector<2x32xf32>
    %cst_5 = arith.constant 0.000000e+00 : f32
    %13 = vector.broadcast %cst_5 : f32 to vector<2x32xf32>
    %14 = arith.maximumf %12, %13 : vector<2x32xf32>
    %15 = vector.extract_strided_slice %14 {offsets = [0, 0], sizes = [1, 16], strides = [1, 1]} : vector<2x32xf32> to vector<1x16xf32>
    %16 = vector.extract_strided_slice %14 {offsets = [1, 0], sizes = [1, 16], strides = [1, 1]} : vector<2x32xf32> to vector<1x16xf32>
    %17 = tpu.concatenate %15, %16 in 1 : vector<1x16xf32>, vector<1x16xf32> -> vector<1x32xf32>
    %18 = vector.extract_strided_slice %14 {offsets = [0, 16], sizes = [1, 16], strides = [1, 1]} : vector<2x32xf32> to vector<1x16xf32>
    %19 = vector.extract_strided_slice %14 {offsets = [1, 16], sizes = [1, 16], strides = [1, 1]} : vector<2x32xf32> to vector<1x16xf32>
    %20 = tpu.concatenate %18, %19 in 1 : vector<1x16xf32>, vector<1x16xf32> -> vector<1x32xf32>
    %21 = tpu.concatenate %17, %20 in 0 : vector<1x32xf32>, vector<1x32xf32> -> vector<2x32xf32>
    %c0_6 = arith.constant 0 : index
    %c0_7 = arith.constant 0 : index
    %22 = vector.load %arg3[%c0_6, %c0_7] : memref<32x10xf32, #tpu.memory_space<vmem>>, vector<32x10xf32>
    %cst_8 = arith.constant dense<0.000000e+00> : vector<2x10xf32>
    %23 = tpu.matmul %21, %22, %cst_8 {dimension_numbers = #tpu.dot_dimension_numbers<[1], [0], [0], [1], [0, 0, 1, 1], [], []>} : vector<2x32xf32>, vector<32x10xf32>, vector<2x10xf32> -> vector<2x10xf32>
    %c0_9 = arith.constant 0 : index
    %c0_10 = arith.constant 0 : index
    %24 = vector.load %arg4[%c0_9, %c0_10] : memref<1x10xf32, #tpu.memory_space<vmem>>, vector<1x10xf32>
    %25 = vector.broadcast %24 : vector<1x10xf32> to vector<2x10xf32>
    %26 = arith.addf %23, %25 : vector<2x10xf32>
    %cst_11 = arith.constant 0.000000e+00 : f32
    %27 = vector.broadcast %cst_11 : f32 to vector<2x10xf32>
    %28 = arith.maximumf %26, %27 : vector<2x10xf32>
    %c0_12 = arith.constant 0 : index
    %c0_13 = arith.constant 0 : index
    %29 = vector.load %arg5[%c0_12, %c0_13] : memref<2x10xf32, #tpu.memory_space<vmem>>, vector<2x10xf32>
    tpu.vector_store %arg5[%c0_12, %c0_13], %28 {strides = array<i32>} : memref<2x10xf32, #tpu.memory_space<vmem>>, vector<2x10xf32>,
    return
  }
}

</mosaic_0001>

<bundles_post_ra>
// kernel: new_conv_nn_forward.1
= control target key start
LH: loop header
LB: loop body
LE: loop exit
PB: predicated region body
PF: predicated region fallthrough
CT: control target
= control target key end

     0   :  { %v489_v4 = vmov 0.0   ;;  %v490_v6 = vmov 1983009808   ;;  %v68_v8 = vlaneseq  ;;  %vm491_vm0 = vmmov 0   ;;  %s693_s0 = inlined_call_operand.vmem [shape: f32[324,128], index: 0, kind: input, shape index: {}]   ;;  %s694_s1 = inlined_call_operand.vmem [shape: f32[2,324], index: 1, kind: input, shape index: {}]   ;;  %s695_s2 = inlined_call_operand.vmem [shape: f32[2,1], index: 2, kind: input, shape index: {}]   ;;  %s696_s3 = inlined_call_operand.vmem [shape: f32[32,10], index: 3, kind: input, shape index: {}]   ;;  %s697_s4 = inlined_call_operand.vmem [shape: f32[1,10], index: 4, kind: input, shape index: {}]   ;;  %s698_s5 = inlined_call_operand.hbm [shape: f32[2,10], index: 5, kind: output, shape index: {}]  }
   0x1   :  { %v53_v0 = vld [vmem:[%s693_s0 + $0xf8] sm:$0xff]  ;;  %v52_v2 = vld [vmem:[%s693_s0 + $0xf0] sm:$0xff]  ;;  %423 = vmatprep.subr.mxu1 %v489_v4  ;;  %v51_v5 = vld [vmem:[%s693_s0 + $0xe8] sm:$0xff]  ;;  %v66_v7 = vunpack.c.l.s4 %v490_v6  ;;  %441 = vmatprep.mubr.msk.f32.mxu1 %vm491_vm0, %v489_v4  ;;  %vm85_vm1 = vcmask 1043456  }
   0x2   :  { %v37_v1 = vld [vmem:[%s693_s0 + $0x78] sm:$0xff]  ;;  %373 = vmatprep.subr.mxu0 %v53_v0  ;;  %v36_v3 = vld [vmem:[%s693_s0 + $0x70] sm:$0xff]  ;;  %v35_v9 = vld [vmem:[%s693_s0 + $0x68] sm:$0xff]  ;;  %v69_v15 = vshrl.u32 %v68_v8, 7 }
   0x3   :  { %374 = vmatpush3.msra.mxu0 %v37_v1  ;;  %v50_v10 = vld [vmem:[%s693_s0 + $0xe0] sm:$0xff]  ;;  %v49_v12 = vld [vmem:[%s693_s0 + $0xd8] sm:$0xff]  ;;  %v67_v14 = vunpack.c.0.s8 %v66_v7  ;;  %v48_v18 = vld [vmem:[%s693_s0 + $0xd0] sm:$0xff] }
   0x4   :  { %375 = vmatprep.subr.mxu0 %v52_v2  ;;  %v34_v11 = vld [vmem:[%s693_s0 + $0x60] sm:$0xff]  ;;  %v33_v16 = vld [vmem:[%s693_s0 + $0x58] sm:$0xff]  ;;  %v60_v19 = vld [vmem:[%s693_s0 + $0x130] sm:$0xff] }
   0x5   :  { %376 = vmatpush3.msra.mxu0 %v36_v3  ;;  %v62_v13 = vld [vmem:[%s693_s0 + $0x140] sm:$0xf]  ;;  %v61_v17 = vld [vmem:[%s693_s0 + $0x138] sm:$0xff]  ;;  %v32_v20 = vld [vmem:[%s693_s0 + $0x50] sm:$0xff]  ;;  %v70_v23 = vsub.s32 %v67_v14, %v69_v15 }
   0x6   :  { %377 = vmatprep.subr.mxu0 %v51_v5  ;;  %424 = vmatpush3.msk.msra.mxu1 %vm85_vm1, %v62_v13  ;;  %v47_v21 = vld [vmem:[%s693_s0 + $0xc8] sm:$0xff]  ;;  %v46_v25 = vld [vmem:[%s693_s0 + $0xc0] sm:$0xff]  ;;  %v45_v29 = vld [vmem:[%s693_s0 + $0xb8] sm:$0xff] }
   0x7   :  { %378 = vmatpush3.msra.mxu0 %v35_v9  ;;  %425 = vmatprep.subr.mxu1 %v489_v4  ;;  %v59_v22 = vld [vmem:[%s693_s0 + $0x128] sm:$0xff]  ;;  %v58_v26 = vld [vmem:[%s693_s0 + $0x120] sm:$0xff]  ;;  %v57_v30 = vld [vmem:[%s693_s0 + $0x118] sm:$0xff] }
   0x8   :  { %379 = vmatprep.subr.mxu0 %v50_v10  ;;  %426 = vmatpush3.msra.mxu1 %v61_v17  ;;  %v31_v24 = vld [vmem:[%s693_s0 + $0x48] sm:$0xff]  ;;  %v30_v27 = vld [vmem:[%s693_s0 + $0x40] sm:$0xff] }
   0x9   :  { %380 = vmatpush3.msra.mxu0 %v34_v11  ;;  %427 = vmatprep.subr.mxu1 %v489_v4  ;;  %v21_v28 = vld [vmem:[%s694_s1] sm:$0x3f] }
   0xa   :  { %381 = vmatprep.subr.mxu0 %v49_v12  ;;  %428 = vmatpush3.msra.mxu1 %v60_v19  ;;  %v71_v31 = vrot.slane %v21_v28, %v70_v23 }
   0xb   :  { %382 = vmatpush3.msra.mxu0 %v33_v16  ;;  %429 = vmatprep.subr.mxu1 %v489_v4 }
   0xc   :  { %383 = vmatprep.subr.mxu0 %v48_v18  ;;  %430 = vmatpush3.msra.mxu1 %v59_v22 }
   0xd   :  { %384 = vmatpush3.msra.mxu0 %v32_v20  ;;  %431 = vmatprep.subr.mxu1 %v489_v4 }
   0xe   :  { %385 = vmatprep.subr.mxu0 %v47_v21 }
   0xf   :  { %386 = vmatpush3.msra.mxu0 %v31_v24 }
  0x10   :  { %10 = vsyncpa [#allocation3], 0  ;;  %387 = vmatprep.subr.mxu0 %v46_v25  ;;  %v29_v32 = vld [vmem:[%s693_s0 + $0x38] sm:$0xff]  ;;  %432 = vmatpush3.msra.mxu1 %v58_v26  ;;  %v44_v33 = vld [vmem:[%s693_s0 + $0xb0] sm:$0xff]  ;;  %v64_v36 = vcombine.high %v21_v28, %v21_v28  ;;  %v79_v37 = vcombine.high %v71_v31, %v71_v31  ;;  %vm82_vm2 = vcmask 556032   ;;  %v492_v53 = vmov 0  }
  0x11   :  { %388 = vmatpush3.msra.mxu0 %v30_v27  ;;  %433 = vmatprep.subr.mxu1 %v489_v4  ;;  %v56_v34 = vld [vmem:[%s693_s0 + $0x110] sm:$0xff]  ;;  %v43_v38 = vld [vmem:[%s693_s0 + $0xa8] sm:$0xff]  ;;  %v42_v41 = vld [vmem:[%s693_s0 + $0xa0] sm:$0xff]  ;;  %s493_s25 = smov 64   ;;  %s494_s26 = smov 96   ;;  %vm255_vm3 = vcmask 130048  }
  0x12   :  { %389 = vmatprep.subr.mxu0 %v45_v29  ;;  %v28_v35 = vld [vmem:[%s693_s0 + $0x30] sm:$0xff]  ;;  %434 = vmatpush3.msra.mxu1 %v57_v30  ;;  %v27_v39 = vld [vmem:[%s693_s0 + $0x28] sm:$0xff]  ;;  %v26_v42 = vld [vmem:[%s693_s0 + $0x20] sm:$0xff]  ;;  %v78_v43 = vrot.slane %v64_v36, %v70_v23  ;;  %s496_s11 = smov 112   ;;  %s497_s12 = smov 16   ;;  %vm265_vm4 = vcmask 1040384  }
  0x13   :  { %390 = vmatpush3.msra.mxu0 %v29_v32  ;;  %435 = vmatprep.subr.mxu1 %v489_v4  ;;  %v55_v40 = vld [vmem:[%s693_s0 + $0x108] sm:$0xff]  ;;  %v54_v44 = vld [vmem:[%s693_s0 + $0x100] sm:$0xff]  ;;  %v41_v45 = vld [vmem:[%s693_s0 + $0x98] sm:$0xff]  ;;  %vm278_vm5 = vcmask 261120   ;;  %s498_s14 = smov [#allocation2]   ;;  %vm353_vm6 = vcmask 74752  }
  0x14   :  { %391 = vmatprep.subr.mxu0 %v44_v33  ;;  %436 = vmatpush3.msra.mxu1 %v56_v34  ;;  %v25_v46 = vld [vmem:[%s693_s0 + $0x18] sm:$0xff]  ;;  %v40_v47 = vld [vmem:[%s693_s0 + $0x90] sm:$0xff]  ;;  %v39_v49 = vld [vmem:[%s693_s0 + $0x88] sm:$0xff]  ;;  %s361_s15 = sshll.u32 %s498_s14, 4  ;;  %s362_s15 = int_to_ptr.vmem [resolvable:$true] %s361_s15 }
  0x15   :  { %392 = vmatpush3.msra.mxu0 %v28_v35  ;;  %437 = vmatprep.subr.mxu1 %v489_v4  ;;  %v24_v48 = vld [vmem:[%s693_s0 + $0x10] sm:$0xff]  ;;  %v23_v50 = vld [vmem:[%s693_s0 + $0x8] sm:$0xff]  ;;  %v38_v51 = vld [vmem:[%s693_s0 + $0x80] sm:$0xff]  ;;  %s467_s16 = scalar_lea.vmem %s362_s15, 32  ;;  %p472_p1 = scmp.lt.s32.totalorder %s362_s15, %s362_s15 }
  0x16   :  { %393 = vmatprep.subr.mxu0 %v43_v38  ;;  %153 = vmatprep.mubr.f32.mxu0 %v79_v37  ;;  %v22_v52 = vld [vmem:[%s693_s0] sm:$0xff]  ;;  %s495_s0 = smov 32   ;;  %v270_v61 = vld [vmem:[%s696_s3 + $0x18] sm:$0xff]  ;;  %v269_v62 = vld [vmem:[%s696_s3 + $0x10] sm:$0xff]  ;;  %p468_p0 = scmp.ne.s32.totalorder %s362_s15, %s467_s16 }
  0x17   :  { %394 = vmatpush3.msra.mxu0 %v27_v39  ;;  %438 = vmatpush3.msra.mxu1 %v55_v40  ;;  %v242_v60 = vld [vmem:[%s695_s2] sm:$0x3]  ;;  %v268_v2 = vld [vmem:[%s696_s3 + $0x8] sm:$0xff]  ;;  %p473_p2 = scmp.lt.s32.totalorder %s467_s16, %s467_s16 }
  0x18   :  { %395 = vmatprep.subr.mxu0 %v42_v41  ;;  %439 = vmatprep.subr.mxu1 %v489_v4  ;;  %v267_v3 = vld [vmem:[%s696_s3] sm:$0xff] }
  0x19   :  { %396 = vmatpush3.msra.mxu0 %v26_v42  ;;  %440 = vmatpush3.msra.mxu1 %v54_v44  ;;  %v371_v17 = vld [vmem:[%s697_s4] ss:$0 sm:$0xff]  ;;  %p474_p3 = por %p473_p2, %p472_p1 }
  0x1a   :  { %397 = vmatprep.subr.mxu0 %v41_v45  ;;  %442 = vmatmul.mubr.msk.f32.vlgmr.msra.gmra.mxu1 %vm82_vm2, %v78_v43 }
  0x1b   :  { %398 = vmatpush3.msra.mxu0 %v25_v46  ;;  %444 = vmatprep.subr.mxu1 %v489_v4  ;;  %p475_p4 = pnand %p474_p3, %p468_p0 }
  0x1c   :  { %399 = vmatprep.subr.mxu0 %v40_v47  ;;  %452 = vmatprep.mubr.msk.f32.mxu1 %vm491_vm0, %v489_v4 }
  0x1d   :  { %400 = vmatpush3.msra.mxu0 %v24_v48  ;;  %465 = vset.pattern.permute.xlu0 %v492_v53 }
  0x1e   :  { %401 = vmatprep.subr.mxu0 %v39_v49  ;;  %445 = vmatpush3.msra.mxu1 %v270_v61 }
  0x1f   :  { %402 = vmatpush3.msra.mxu0 %v23_v50  ;;  %446 = vmatprep.subr.mxu1 %v489_v4 }
  0x20   :  { %403 = vmatprep.subr.mxu0 %v38_v51  ;;  %447 = vmatpush3.msra.mxu1 %v269_v62 }
  0x21   :  { %404 = vmatpush3.msra.mxu0 %v22_v52  ;;  %448 = vmatprep.subr.mxu1 %v489_v4 }
  0x22   :  { %154 = vmatmul.mubr.f32.vlgmr.msra.gmra.mxu0 %v71_v31  ;;  %449 = vmatpush3.msra.mxu1 %v268_v2 }
  0x23   :  { %450 = vmatprep.subr.mxu1 %v489_v4 }
  0x24   :  { %451 = vmatpush3.msra.mxu1 %v267_v3 }
  0xda   :  { %v225_v54 = vpop.f32.mrf.mxu1 }
  0xdc   :  { %v443_v55 = vpop.f32.mrf.mxu1 }
  0xe2   :  { %v405_v56 = vpop.f32.mrf.mxu0 }
  0xe4   :  { %v406_v57 = vpop.f32.mrf.mxu0 }
  0xe5   :  { %v407_v58 = vadd.f32 %v406_v57, %v405_v56 }
  0xe7   :  { %v226_v59 = vadd.f32 %v407_v58, %v225_v54 }
  0xe9   :  { %234 = vrot.lane.b32.xlu1 %v226_v59, %s493_s25  ;;  %230 = vrot.lane.b32.xlu0 %v226_v59, %s494_s26 }
  0xed   :  { %238 = vrot.lane.b32.xlu1 %v226_v59, %s495_s0  ;;  %245 = vperm.xlu0 %465, %v242_v60  }
 0x15b   :  { %v231_v63 = vpop.permute.xlu0 %230  ;;  %v235_v0 = vpop.permute.xlu1 %234 }
 0x15c   :  { %v233_v1 = vmax.f32 %v226_v59, %v231_v63 }
 0x15e   :  { %v237_v5 = vmax.f32 %v233_v1, %v235_v0 }
 0x15f   :  { %v239_v6 = vpop.permute.xlu1 %238 }
 0x160   :  { %v241_v7 = vmax.f32 %v237_v5, %v239_v6 }
 0x168   :  { %v246_v8 = vpop.permute.xlu0 %245 }
 0x169   :  { %v248_v9 = vadd.f32 %v246_v8, %v241_v7 }
 0x16b   :  { %v249_v10 = vmax.f32 %v248_v9, 0.0 }
 0x16d   :  { %257 = vrot.lane.b32.xlu1 %v249_v10, %s496_s11  ;;  %v251_v11 = vrot.slane %v249_v10, 1 }
 0x16f   :  { %252 = vrot.lane.b32.xlu0 %v251_v11, %s497_s12 }
 0x1df   :  { %v258_v12 = vpop.permute.xlu1 %257 }
 0x1e0   :  { %v261_v13 = vsel %vm255_vm3, %v258_v12, %v251_v11 }
 0x1e1   :  { %v263_v4 = vrot.slane %v261_v13, 7  ;;  %v253_v14 = vpop.permute.xlu0 %252 }
 0x1e2   :  { %v256_v15 = vsel %vm255_vm3, %v249_v10, %v253_v14 }
 0x1e3   :  { %v266_v16 = vsel %vm265_vm4, %v256_v15, %v263_v4 }
 0x1e4   :  { %453 = vmatmul.mubr.msk.f32.vlgmr.msra.gmra.mxu1 %vm278_vm5, %v266_v16 }
 0x2a4   :  { %v348_v18 = vpop.f32.mrf.mxu1 }
 0x2a5   :  { %v349_v19 = vadd.f32 %v371_v17, %v348_v18 }
 0x2a6   :  { %v454_v20 = vpop.f32.mrf.mxu1 }
 0x2a7   :  { %v352_v21 = vmax.f32 %v349_v19, 0.0 }
 0x2a9   :  { %354 = vst.msk [vmem:[#allocation2] sm:$0x3] %vm353_vm6, %v352_v21 }
 0x2aa   :  { %478 = shalt.err (!%p475_p4)
}
 0x2ab   :  { %364 = dma.vmem_to_hbm [thread:$0]  %s362_s15, 32, %s698_s5, [#allocation3]  }
 0x2ac   :  { %487 = dma.done.wait [#allocation3], 32  }
 0x2ad   :  { %488 = vsyncadd [#allocation3], 4294967264 }
 0x2ae   :  { %368 = vsyncpa [#allocation3], 1 }

</bundles_post_ra>
